<compile_context>
chip_gen: v5e
topology: v5e:2x2
jax: 0.10.0
libtpu: 0.0.40
codegen_flags: <defaults>
</compile_context>

<pallas_src>
import jax
import jax.numpy as jnp
from jax import lax
from jax.experimental import pallas as pl
from jax.experimental.pallas import tpu as pltpu

EPS = 1e-5


def repvgg_kernel(x_ref, w_ref, b_ref, o_ref, xs_ref, acc_ref):
    # x_ref  : (1, H, W, Cin)    unpadded NHWC image (bf16), block resident per batch index
    # w_ref  : (3, 3*Cin, TCO)   reparam-folded weights, kw packed into K (bf16)
    # b_ref  : (1, TCO)          folded bias (f32)
    # o_ref  : (1, TH, W, TCO)   output tile (f32)
    # xs_ref : (H+2, W, 3*Cin)   VMEM staging: H-padded, kw-packed activations (bf16)
    # acc_ref: (TH*W, TCO)       f32 accumulator scratch
    _, H, W, Cin = x_ref.shape
    _, TH, _, TCO = o_ref.shape
    K = 3 * Cin

    # Build the padded / kw-packed staging buffer once per batch image
    # (first (h, co) grid step for this batch index; h/co axes are "arbitrary"
    # so all their steps for a given batch run sequentially on the same core).
    @pl.when((pl.program_id(1) == 0) & (pl.program_id(2) == 0))
    def _fill_staging():
        xc = x_ref[0]                                               # (H, W, Cin)
        zcol = jnp.zeros((H, 1, Cin), xc.dtype)
        left = jnp.concatenate([zcol, xc[:, :W - 1, :]], axis=1)    # x[h, w-1] (0 at w=0)
        right = jnp.concatenate([xc[:, 1:, :], zcol], axis=1)       # x[h, w+1] (0 at w=W-1)
        packed = jnp.concatenate([left, xc, right], axis=2)         # (H, W, 3*Cin)
        zrow = jnp.zeros((W, K), xc.dtype)
        xs_ref[0] = zrow                                            # top pad row
        xs_ref[H + 1] = zrow                                        # bottom pad row
        xs_ref[1:H + 1] = packed

    # 3 MXU matmuls (one per kernel row), K = 3*Cin, f32 accumulation in VMEM.
    h0 = pl.multiple_of(pl.program_id(1) * TH, TH)
    for kh in range(3):
        patch = xs_ref[pl.ds(h0 + kh, TH)].reshape(TH * W, K)       # cheap leading-dim slab
        contrib = jnp.dot(patch, w_ref[kh], preferred_element_type=jnp.float32)
        if kh == 0:
            acc_ref[...] = contrib
        else:
            acc_ref[...] += contrib

    out = jnp.maximum(acc_ref[...] + b_ref[...], 0.0)
    o_ref[...] = out.reshape(1, TH, W, TCO).astype(o_ref.dtype)


def fuse_bn(gamma, beta, mean, var, eps=EPS):
    std = jnp.sqrt(var + eps)
    scale = gamma / std
    return scale, beta - mean * scale


def repvgg_block(x_nchw, p, *, tile_h=None, tile_co=None):
    """RepVGGBlock forward (stride=1). x_nchw: (B, Cin, H, W) f32 -> (B, Cout, H, W) f32."""
    B, Cin, H, W = x_nchw.shape
    Cout = p["w3"].shape[0]

    # ---- Reparameterize: fold all three branches into one 3x3 conv + bias (eval-mode BN) ----
    s3, b3 = fuse_bn(p["g3"], p["b3"], p["m3"], p["v3"])
    s1, b1 = fuse_bn(p["g1"], p["b1"], p["m1"], p["v1"])

    w_eq = jnp.transpose(p["w3"], (2, 3, 1, 0)) * s3[None, None, None, :]   # (3,3,Cin,Cout) HWIO
    w1c = jnp.transpose(p["w1"][:, :, 0, 0], (1, 0)) * s1[None, :]          # (Cin,Cout)
    center = w_eq[1, 1] + w1c
    bias = b3 + b1
    if Cin == Cout:  # identity BN branch only exists when in_ch == out_ch (and stride == 1)
        sid, bid = fuse_bn(p["gi"], p["bi"], p["mi"], p["vi"])
        center = center + jnp.diag(sid)
        bias = bias + bid
    w_eq = w_eq.at[1, 1].set(center)

    # Pack kw taps into the contraction dim: (3, 3*Cin, Cout), K index = kw*Cin + i.
    w_packed = w_eq.reshape(3, 3 * Cin, Cout).astype(jnp.bfloat16)
    bias = bias.reshape(1, Cout).astype(jnp.float32)

    # NCHW -> NHWC (lane dim = channels), bf16 activations.
    x = jnp.transpose(x_nchw, (0, 2, 3, 1)).astype(jnp.bfloat16)

    # ---- Tiling ----
    if tile_h is None:
        tile_h = 8 if H % 8 == 0 else H
    if tile_co is None:
        tile_co = 128 if Cout % 128 == 0 else Cout
    assert H % tile_h == 0 and Cout % tile_co == 0
    n_h, n_co = H // tile_h, Cout // tile_co

    out_nhwc = pl.pallas_call(
        repvgg_kernel,
        out_shape=jax.ShapeDtypeStruct((B, H, W, Cout), jnp.float32),
        grid=(B, n_h, n_co),
        in_specs=[
            # Full image per batch index; constant over (h, co) -> DMAed once per image.
            pl.BlockSpec((1, H, W, Cin), lambda b, h, c: (b, 0, 0, 0)),
            pl.BlockSpec((3, 3 * Cin, tile_co), lambda b, h, c: (0, 0, c)),
            pl.BlockSpec((1, tile_co), lambda b, h, c: (0, c)),
        ],
        out_specs=pl.BlockSpec((1, tile_h, W, tile_co), lambda b, h, c: (b, h, 0, c)),
        scratch_shapes=[
            pltpu.VMEM((H + 2, W, 3 * Cin), jnp.bfloat16),   # padded + kw-packed staging
            pltpu.VMEM((tile_h * W, tile_co), jnp.float32),  # f32 accumulator
        ],
        compiler_params=pltpu.CompilerParams(
            dimension_semantics=("parallel", "arbitrary", "arbitrary"),
            vmem_limit_bytes=48 * 1024 * 1024,
        ),
    )(x, w_packed, bias)

    return jnp.transpose(out_nhwc, (0, 3, 1, 2))


def repvgg_reference(x_nchw, p):
    """Pure-JAX f32 reference mirroring the PyTorch forward (eval-mode BN)."""
    def bn(y, gamma, beta, mean, var, eps=EPS):
        s = (gamma / jnp.sqrt(var + eps)).reshape(1, -1, 1, 1)
        b = (beta - mean * gamma / jnp.sqrt(var + eps)).reshape(1, -1, 1, 1)
        return y * s + b

    cin, cout = x_nchw.shape[1], p["w3"].shape[0]

    dense = lax.conv_general_dilated(
        x_nchw, p["w3"], (1, 1), ((1, 1), (1, 1)),
        dimension_numbers=("NCHW", "OIHW", "NCHW"))
    dense = bn(dense, p["g3"], p["b3"], p["m3"], p["v3"])

    one = lax.conv_general_dilated(
        x_nchw, p["w1"], (1, 1), ((0, 0), (0, 0)),
        dimension_numbers=("NCHW", "OIHW", "NCHW"))
    one = bn(one, p["g1"], p["b1"], p["m1"], p["v1"])

    iden = bn(x_nchw, p["gi"], p["bi"], p["mi"], p["vi"]) if cin == cout else 0.0
    return jnp.maximum(dense + one + iden, 0.0)


def make_params(key, cin, cout):
    ks = jax.random.split(key, 13)
    f32 = jnp.float32
    return {
        # rbr_dense: Conv2d(cin, cout, 3, bias=False) + BN(cout)
        "w3": jax.random.normal(ks[0], (cout, cin, 3, 3), f32) * 0.2,
        "g3": jax.random.uniform(ks[1], (cout,), f32, 0.5, 1.5),
        "b3": jax.random.normal(ks[2], (cout,), f32) * 0.1,
        "m3": jax.random.normal(ks[3], (cout,), f32) * 0.1,
        "v3": jax.random.uniform(ks[4], (cout,), f32, 0.5, 1.5),
        # rbr_1x1: Conv2d(cin, cout, 1, bias=False) + BN(cout)
        "w1": jax.random.normal(ks[5], (cout, cin, 1, 1), f32) * 0.2,
        "g1": jax.random.uniform(ks[6], (cout,), f32, 0.5, 1.5),
        "b1": jax.random.normal(ks[7], (cout,), f32) * 0.1,
        "m1": jax.random.normal(ks[8], (cout,), f32) * 0.1,
        "v1": jax.random.uniform(ks[9], (cout,), f32, 0.5, 1.5),
        # rbr_identity: BN(cin)
        "gi": jax.random.uniform(ks[10], (cin,), f32, 0.5, 1.5),
        "bi": jax.random.normal(ks[11], (cin,), f32) * 0.1,
        "mi": jax.random.normal(ks[12], (cin,), f32) * 0.1,
        "vi": jax.random.uniform(ks[0], (cin,), f32, 0.5, 1.5),
    }


if __name__ == "__main__":
    B, C, H, W = 2, 4, 16, 16   # in_channels == out_channels, stride=1 -> identity branch active
    key = jax.random.PRNGKey(0)
    kx, kp = jax.random.split(key)
    x = jax.random.normal(kx, (B, C, H, W), jnp.float32)
    params = make_params(kp, C, C)

    fwd = jax.jit(repvgg_block)
    out = jax.block_until_ready(fwd(x, params))
    ref = jax.block_until_ready(repvgg_reference(x, params))

    assert out.shape == (B, C, H, W)
    max_err = float(jnp.max(jnp.abs(out - ref)))
    # bf16 activations/weights with f32 accumulation -> looser tolerance than pure f32.
    assert jnp.allclose(out, ref, atol=6e-2, rtol=6e-2), max_err
    print("KERNEL_OK")
</pallas_src>

<mosaic_0001>
module attributes {stable_mosaic.version = 11 : i64} {
  func.func @repvgg_kernel(%arg0: i32, %arg1: i32, %arg2: i32, %arg3: memref<1x16x16x4xbf16, #tpu.memory_space<vmem>>, %arg4: memref<3x12x4xbf16, #tpu.memory_space<vmem>>, %arg5: memref<1x4xf32, #tpu.memory_space<vmem>>, %arg6: memref<1x8x16x4xf32, #tpu.memory_space<vmem>>, %arg7: memref<18x16x12xbf16, #tpu.memory_space<vmem>>, %arg8: memref<128x4xf32, #tpu.memory_space<vmem>>) attributes {dimension_semantics = [#tpu.dimension_semantics<parallel>, #tpu.dimension_semantics<arbitrary>, #tpu.dimension_semantics<arbitrary>], iteration_bounds = array<i64: 2, 2, 1>, scalar_prefetch = 0 : i64, scratch_operands = 2 : i64, tpu.core_type = #tpu.core_type<tc>, window_params = [{transform_indices = @transform_0, window_bounds = array<i64: 1, 16, 16, 4>}, {transform_indices = @transform_1, window_bounds = array<i64: 3, 12, 4>}, {transform_indices = @transform_2, window_bounds = array<i64: 1, 4>}, {transform_indices = @transform_3, window_bounds = array<i64: 1, 8, 16, 4>}]} {
    %c0_i32 = arith.constant 0 : i32
    %0 = arith.cmpi eq, %arg1, %c0_i32 : i32
    %c0_i32_0 = arith.constant 0 : i32
    %1 = arith.cmpi eq, %arg2, %c0_i32_0 : i32
    %2 = arith.andi %0, %1 : i1
    %3 = arith.extui %2 : i1 to i32
    %c0_i32_1 = arith.constant 0 : i32
    %4 = arith.cmpi ne, %3, %c0_i32_1 : i32
    scf.if %4 {
      %c0_36 = arith.constant 0 : index
      %c0_37 = arith.constant 0 : index
      %c0_38 = arith.constant 0 : index
      %c0_39 = arith.constant 0 : index
      %43 = vector.load %arg3[%c0_36, %c0_37, %c0_38, %c0_39] : memref<1x16x16x4xbf16, #tpu.memory_space<vmem>>, vector<1x16x16x4xbf16>
      %44 = vector.shape_cast %43 : vector<1x16x16x4xbf16> to vector<16x16x4xbf16>
      %cst_40 = arith.constant 0.000000e+00 : bf16
      %45 = vector.broadcast %cst_40 : bf16 to vector<16x1x4xbf16>
      %46 = vector.extract_strided_slice %44 {offsets = [0, 0, 0], sizes = [16, 15, 4], strides = [1, 1, 1]} : vector<16x16x4xbf16> to vector<16x15x4xbf16>
      %47 = tpu.concatenate %45, %46 in 1 : vector<16x1x4xbf16>, vector<16x15x4xbf16> -> vector<16x16x4xbf16>
      %48 = vector.extract_strided_slice %44 {offsets = [0, 1, 0], sizes = [16, 15, 4], strides = [1, 1, 1]} : vector<16x16x4xbf16> to vector<16x15x4xbf16>
      %49 = tpu.concatenate %48, %45 in 1 : vector<16x15x4xbf16>, vector<16x1x4xbf16> -> vector<16x16x4xbf16>
      %50 = tpu.concatenate %47, %44, %49 in 2 : vector<16x16x4xbf16>, vector<16x16x4xbf16>, vector<16x16x4xbf16> -> vector<16x16x12xbf16>
      %cst_41 = arith.constant 0.000000e+00 : bf16
      %51 = vector.broadcast %cst_41 : bf16 to vector<16x12xbf16>
      %c0_42 = arith.constant 0 : index
      %c0_43 = arith.constant 0 : index
      %c0_44 = arith.constant 0 : index
      %52 = vector.load %arg7[%c0_42, %c0_43, %c0_44] : memref<18x16x12xbf16, #tpu.memory_space<vmem>>, vector<1x16x12xbf16>
      %53 = vector.shape_cast %52 : vector<1x16x12xbf16> to vector<16x12xbf16>
      %54 = vector.shape_cast %51 : vector<16x12xbf16> to vector<1x16x12xbf16>
      tpu.vector_store %arg7[%c0_42, %c0_43, %c0_44], %54 {strides = array<i32>} : memref<18x16x12xbf16, #tpu.memory_space<vmem>>, vector<1x16x12xbf16>,
      %c17 = arith.constant 17 : index
      %c0_45 = arith.constant 0 : index
      %c0_46 = arith.constant 0 : index
      %55 = vector.load %arg7[%c17, %c0_45, %c0_46] : memref<18x16x12xbf16, #tpu.memory_space<vmem>>, vector<1x16x12xbf16>
      %56 = vector.shape_cast %55 : vector<1x16x12xbf16> to vector<16x12xbf16>
      %57 = vector.shape_cast %51 : vector<16x12xbf16> to vector<1x16x12xbf16>
      tpu.vector_store %arg7[%c17, %c0_45, %c0_46], %57 {strides = array<i32>} : memref<18x16x12xbf16, #tpu.memory_space<vmem>>, vector<1x16x12xbf16>,
      %c1_47 = arith.constant 1 : index
      %c0_48 = arith.constant 0 : index
      %c0_49 = arith.constant 0 : index
      %58 = vector.load %arg7[%c1_47, %c0_48, %c0_49] : memref<18x16x12xbf16, #tpu.memory_space<vmem>>, vector<16x16x12xbf16>
      tpu.vector_store %arg7[%c1_47, %c0_48, %c0_49], %50 {strides = array<i32>} : memref<18x16x12xbf16, #tpu.memory_space<vmem>>, vector<16x16x12xbf16>,
    } else {
    }
    %c8_i32 = arith.constant 8 : i32
    %5 = arith.muli %arg1, %c8_i32 : i32
    %6 = tpu.assume_multiple %5, 8 : i32
    %c0_i32_2 = arith.constant 0 : i32
    %7 = arith.addi %6, %c0_i32_2 : i32
    %8 = arith.index_cast %7 : i32 to index
    %c0 = arith.constant 0 : index
    %c0_3 = arith.constant 0 : index
    %9 = vector.load %arg7[%8, %c0, %c0_3] : memref<18x16x12xbf16, #tpu.memory_space<vmem>>, vector<8x16x12xbf16>
    %10 = vector.shape_cast %9 : vector<8x16x12xbf16> to vector<128x12xbf16>
    %c0_4 = arith.constant 0 : index
    %c0_5 = arith.constant 0 : index
    %c0_6 = arith.constant 0 : index
    %11 = vector.load %arg4[%c0_4, %c0_5, %c0_6] : memref<3x12x4xbf16, #tpu.memory_space<vmem>>, vector<1x12x4xbf16>
    %12 = vector.shape_cast %11 : vector<1x12x4xbf16> to vector<12x4xbf16>
    %cst = arith.constant dense<0.000000e+00> : vector<128x4xf32>
    %13 = tpu.matmul %10, %12, %cst {dimension_numbers = #tpu.dot_dimension_numbers<[1], [0], [0], [1], [0, 0, 1, 1], [], []>} : vector<128x12xbf16>, vector<12x4xbf16>, vector<128x4xf32> -> vector<128x4xf32>
    %c0_7 = arith.constant 0 : index
    %c0_8 = arith.constant 0 : index
    %14 = vector.load %arg8[%c0_7, %c0_8] : memref<128x4xf32, #tpu.memory_space<vmem>>, vector<128x4xf32>
    tpu.vector_store %arg8[%c0_7, %c0_8], %13 {strides = array<i32>} : memref<128x4xf32, #tpu.memory_space<vmem>>, vector<128x4xf32>,
    %c1_i32 = arith.constant 1 : i32
    %15 = arith.addi %6, %c1_i32 : i32
    %16 = arith.index_cast %15 : i32 to index
    %c0_9 = arith.constant 0 : index
    %c0_10 = arith.constant 0 : index
    %17 = vector.load %arg7[%16, %c0_9, %c0_10] : memref<18x16x12xbf16, #tpu.memory_space<vmem>>, vector<8x16x12xbf16>
    %18 = vector.shape_cast %17 : vector<8x16x12xbf16> to vector<128x12xbf16>
    %c1 = arith.constant 1 : index
    %c0_11 = arith.constant 0 : index
    %c0_12 = arith.constant 0 : index
    %19 = vector.load %arg4[%c1, %c0_11, %c0_12] : memref<3x12x4xbf16, #tpu.memory_space<vmem>>, vector<1x12x4xbf16>
    %20 = vector.shape_cast %19 : vector<1x12x4xbf16> to vector<12x4xbf16>
    %cst_13 = arith.constant dense<0.000000e+00> : vector<128x4xf32>
    %21 = tpu.matmul %18, %20, %cst_13 {dimension_numbers = #tpu.dot_dimension_numbers<[1], [0], [0], [1], [0, 0, 1, 1], [], []>} : vector<128x12xbf16>, vector<12x4xbf16>, vector<128x4xf32> -> vector<128x4xf32>
    %c0_14 = arith.constant 0 : index
    %c0_15 = arith.constant 0 : index
    %22 = vector.load %arg8[%c0_14, %c0_15] : memref<128x4xf32, #tpu.memory_space<vmem>>, vector<128x4xf32>
    %23 = arith.addf %22, %21 : vector<128x4xf32>
    %c0_16 = arith.constant 0 : index
    %c0_17 = arith.constant 0 : index
    %24 = vector.load %arg8[%c0_16, %c0_17] : memref<128x4xf32, #tpu.memory_space<vmem>>, vector<128x4xf32>
    tpu.vector_store %arg8[%c0_16, %c0_17], %23 {strides = array<i32>} : memref<128x4xf32, #tpu.memory_space<vmem>>, vector<128x4xf32>,
    %c2_i32 = arith.constant 2 : i32
    %25 = arith.addi %6, %c2_i32 : i32
    %26 = arith.index_cast %25 : i32 to index
    %c0_18 = arith.constant 0 : index
    %c0_19 = arith.constant 0 : index
    %27 = vector.load %arg7[%26, %c0_18, %c0_19] : memref<18x16x12xbf16, #tpu.memory_space<vmem>>, vector<8x16x12xbf16>
    %28 = vector.shape_cast %27 : vector<8x16x12xbf16> to vector<128x12xbf16>
    %c2 = arith.constant 2 : index
    %c0_20 = arith.constant 0 : index
    %c0_21 = arith.constant 0 : index
    %29 = vector.load %arg4[%c2, %c0_20, %c0_21] : memref<3x12x4xbf16, #tpu.memory_space<vmem>>, vector<1x12x4xbf16>
    %30 = vector.shape_cast %29 : vector<1x12x4xbf16> to vector<12x4xbf16>
    %cst_22 = arith.constant dense<0.000000e+00> : vector<128x4xf32>
    %31 = tpu.matmul %28, %30, %cst_22 {dimension_numbers = #tpu.dot_dimension_numbers<[1], [0], [0], [1], [0, 0, 1, 1], [], []>} : vector<128x12xbf16>, vector<12x4xbf16>, vector<128x4xf32> -> vector<128x4xf32>
    %c0_23 = arith.constant 0 : index
    %c0_24 = arith.constant 0 : index
    %32 = vector.load %arg8[%c0_23, %c0_24] : memref<128x4xf32, #tpu.memory_space<vmem>>, vector<128x4xf32>
    %33 = arith.addf %32, %31 : vector<128x4xf32>
    %c0_25 = arith.constant 0 : index
    %c0_26 = arith.constant 0 : index
    %34 = vector.load %arg8[%c0_25, %c0_26] : memref<128x4xf32, #tpu.memory_space<vmem>>, vector<128x4xf32>
    tpu.vector_store %arg8[%c0_25, %c0_26], %33 {strides = array<i32>} : memref<128x4xf32, #tpu.memory_space<vmem>>, vector<128x4xf32>,
    %c0_27 = arith.constant 0 : index
    %c0_28 = arith.constant 0 : index
    %35 = vector.load %arg8[%c0_27, %c0_28] : memref<128x4xf32, #tpu.memory_space<vmem>>, vector<128x4xf32>
    %c0_29 = arith.constant 0 : index
    %c0_30 = arith.constant 0 : index
    %36 = vector.load %arg5[%c0_29, %c0_30] : memref<1x4xf32, #tpu.memory_space<vmem>>, vector<1x4xf32>
    %37 = vector.broadcast %36 : vector<1x4xf32> to vector<128x4xf32>
    %38 = arith.addf %35, %37 : vector<128x4xf32>
    %cst_31 = arith.constant 0.000000e+00 : f32
    %39 = vector.broadcast %cst_31 : f32 to vector<128x4xf32>
    %40 = arith.maximumf %38, %39 : vector<128x4xf32>
    %41 = vector.shape_cast %40 : vector<128x4xf32> to vector<1x8x16x4xf32>
    %c0_32 = arith.constant 0 : index
    %c0_33 = arith.constant 0 : index
    %c0_34 = arith.constant 0 : index
    %c0_35 = arith.constant 0 : index
    %42 = vector.load %arg6[%c0_32, %c0_33, %c0_34, %c0_35] : memref<1x8x16x4xf32, #tpu.memory_space<vmem>>, vector<1x8x16x4xf32>
    tpu.vector_store %arg6[%c0_32, %c0_33, %c0_34, %c0_35], %41 {strides = array<i32>} : memref<1x8x16x4xf32, #tpu.memory_space<vmem>>, vector<1x8x16x4xf32>,
    return
  }
  func.func @transform_0(%arg0: i32, %arg1: i32, %arg2: i32) -> (i32, i32, i32, i32) {
    %c0_i32 = arith.constant 0 : i32
    %c0_i32_0 = arith.constant 0 : i32
    %c0_i32_1 = arith.constant 0 : i32
    %c0_i32_2 = arith.constant 0 : i32
    return %arg0, %c0_i32, %c0_i32_0, %c0_i32_1 : i32, i32, i32, i32
  }
  func.func @transform_1(%arg0: i32, %arg1: i32, %arg2: i32) -> (i32, i32, i32) {
    %c0_i32 = arith.constant 0 : i32
    %c0_i32_0 = arith.constant 0 : i32
    %c0_i32_1 = arith.constant 0 : i32
    return %c0_i32, %c0_i32_0, %arg2 : i32, i32, i32
  }
  func.func @transform_2(%arg0: i32, %arg1: i32, %arg2: i32) -> (i32, i32) {
    %c0_i32 = arith.constant 0 : i32
    %c0_i32_0 = arith.constant 0 : i32
    return %c0_i32, %arg2 : i32, i32
  }
  func.func @transform_3(%arg0: i32, %arg1: i32, %arg2: i32) -> (i32, i32, i32, i32) {
    %c0_i32 = arith.constant 0 : i32
    %c0_i32_0 = arith.constant 0 : i32
    return %arg0, %arg1, %c0_i32, %arg2 : i32, i32, i32, i32
  }
}

</mosaic_0001>

<bundles_post_ra>
// kernel: repvgg_block.1
= control target key start
LH: loop header
LB: loop body
LE: loop exit
PB: predicated region body
PF: predicated region fallthrough
CT: control target
= control target key end

     0   :  { %s2056_s12 = smov 0   ;;  %s2058_s13 = smov 0   ;;  %s2680_s0 = inlined_call_operand.vmem [shape: bf16[2,16,16,4], index: 0, kind: input, shape index: {}]   ;;  %s2681_s1 = inlined_call_operand.vmem [shape: bf16[3,12,4], index: 1, kind: input, shape index: {}]   ;;  %s2682_s2 = inlined_call_operand.vmem [shape: f32[1,4], index: 2, kind: input, shape index: {}]   ;;  %s2683_s3 = inlined_call_operand.vmem [shape: f32[2,16,16,4], index: 3, kind: output, shape index: {}]  }
   0x1   :  { %s2060_s14 = smov 0   ;;  %s2062_s15 = smov 0  }
   0x2   :  { %s2064_s16 = smov 0  }
   0x3 LB: > { %s28_s17 = sadd.s32 1, %s2023_s14  ;;  %s32_s18 = sadd.s32 1, %s2027_s15  ;;  %s2031_s16 = sphi %s2064_s16, %s13_s16   ;;  %s2027_s15 = sphi %s2062_s15, %s2691_s15   ;;  %s2023_s14 = sphi %s2060_s14, %s2690_s14   ;;  %s2019_s13 = sphi %s2058_s13, %s2689_s13   ;;  %s2015_s12 = sphi %s2056_s12, %s2688_s12  }
   0x4   : > { %p30_p0 = scmp.ge.s32.totalorder %s28_s17, 2  ;;  %p1648_p1 = scmp.ge.s32.totalorder %s2031_s16, 1 }
   0x5   : > { %p177_p2 = scmp.lt.s32.totalorder %s2031_s16, 5 }
   0x6   : > { %s2693_s17 = smov (%p30_p0, %s28_s17), 0  ;;  %s2695_s18 = smov (!%p30_p0, %s32_s18), %s2027_s15 }
   0x7   : > { %p178_p3 = pnand %p1648_p1, %p177_p2  ;;  %p34_p4 = scmp.ge.s32.totalorder %s2695_s18, 2 }
   0x8   : > { %p216_p5 = scmp.lt.s32.totalorder (!%p178_p3), %s2019_s13, 1  ;;  %s1651_s19 = sshll.u32 (!%p178_p3), %s2015_s12, 3 }
   0x9   : > { %s2697_s18 = smov (%p34_p4, %s2695_s18), 0  ;;  %181 = sbr.rel (%p178_p3) target bundleno = 478 (0x1de), region = 32 }
   0xa   : > { %p231_p6 = scmp.lt.s32.totalorder (!%p178_p3), %s1651_s19, 15  ;;  %p243_p7 = scmp.eq.s32.totalorder (!%p178_p3), %s2015_s12, 0 }
   0xe   : > { %s2699_s13 = smov (!%p216_p5, %s2019_s13), 1  ;;  %s2701_s19 = smov (!%p231_p6, %s1651_s19), 15  ;;  %vm556_vm0 = vcmask (%p243_p7), 1047552   ;;  %vm557_vm1 = vsmask.f32 (%p243_p7), 7424  ;;  %vm489_vm3 = vcmask (%p243_p7), 1040384  }
   0xf   : > { %s1897_s20 = sshll.u32 %s2699_s13, 7  ;;  %s1653_s21 = sshll.u32 %s2699_s13, 5  ;;  %vm2189_vm2 = vmand (%p243_p7), %vm556_vm0, %vm557_vm1  ;;  %vm490_vm4 = vsmask.f32 (%p243_p7), 256  ;;  %vm655_vm6 = vcmask (%p243_p7), 31744   ;;  %vm704_vm7 = vcmask (%p243_p7), 64512  }
  0x10   : > { %s2093_s24 = scalar_lea.vmem %s2680_s0, %s1897_s20  ;;  %s1652_s25 = sshll.u32 %s2701_s19, 1  ;;  %vm2310_vm5 = vmand (%p243_p7), %vm489_vm3, %vm490_vm4  ;;  %vm737_vm8 = vcmask (%p243_p7), 93184  }
  0x11   : > { %s238_s26 = sadd.s32 %s1653_s21, %s1652_s25  ;;  %248 = sbr.rel (!%p243_p7) target bundleno = 223 (0xdf), region = 36  ;;  %v2101_v0 = vld [vmem:[%s2093_s24 + $0x20] sm:$0xff] (%p243_p7)  ;;  %v2104_v1 = vld [vmem:[%s2093_s24 + $0x10] sm:$0xff] (%p243_p7)  ;;  %v2116_v3 = vld [vmem:[%s2093_s24 + $0x28] sm:$0xff] (%p243_p7) }
  0x12   : > { %s1654_s27 = sshll.u32 %s238_s26, 3  ;;  %v2107_v2 = vld [vmem:[%s2093_s24] sm:$0xff] (%p243_p7)  ;;  %s2033_s4 = smov (%p243_p7), 4   ;;  %v2119_v4 = vld [vmem:[%s2093_s24 + $0x18] sm:$0xff] (%p243_p7)  ;;  %v2122_v5 = vld [vmem:[%s2093_s24 + $0x8] sm:$0xff] (%p243_p7)  ;;  %v393_v21 = vshll.u32 (%p243_p7), %v2101_v0, 16 }
  0x13   : > { %s2098_s30 = scalar_lea.vmem %s2683_s3, %s1654_s27  ;;  %583 = vrot.lane.b32.xlu2 (%p243_p7), %v2101_v0, %s2033_s4  ;;  %579 = vrot.lane.b32.xlu1 (%p243_p7), %v2104_v1, %s2033_s4  ;;  %v2131_v6 = vld [vmem:[%s2093_s24 + $0x40] sm:$0xff] (%p243_p7)  ;;  %v2134_v7 = vld [vmem:[%s2093_s24 + $0x38] sm:$0xff] (%p243_p7)  ;;  %v372_v12 = vshll.u32 (%p243_p7), %v2122_v5, 16  ;;  %v365_v13 = vshll.u32 (%p243_p7), %v2107_v2, 16  ;;  %v369_v17 = vshrl.u32 (%p243_p7), %v2122_v5, 16  ;;  %v362_v19 = vshrl.u32 (%p243_p7), %v2107_v2, 16 }
  0x14   : > { %575 = vrot.lane.b32.xlu0 (%p243_p7), %v2107_v2, %s2033_s4  ;;  %v2137_v8 = vld [vmem:[%s2093_s24 + $0x30] sm:$0xff] (%p243_p7)  ;;  %v2146_v9 = vld [vmem:[%s2093_s24 + $0x58] sm:$0xff] (%p243_p7)  ;;  %v2152_v11 = vld [vmem:[%s2093_s24 + $0x48] sm:$0xff] (%p243_p7)  ;;  %v386_v22 = vshll.u32 (%p243_p7), %v2119_v4, 16  ;;  %v379_v26 = vshll.u32 (%p243_p7), %v2104_v1, 16  ;;  %v390_v27 = vshrl.u32 (%p243_p7), %v2101_v0, 16 }
  0x15   : > { %v2149_v10 = vld [vmem:[%s2093_s24 + $0x50] sm:$0xff] (%p243_p7)  ;;  %v2166_v15 = vld [vmem:[%s2093_s24 + $0x68] sm:$0xff] (%p243_p7)  ;;  %v2169_v16 = vld [vmem:[%s2093_s24 + $0x60] sm:$0xff] (%p243_p7)  ;;  %v510_v18 = vrot.slane (%p243_p7), %v372_v12, 1  ;;  %v508_v20 = vrot.slane (%p243_p7), %v365_v13, 1  ;;  %v516_v28 = vrot.slane (%p243_p7), %v393_v21, 1 }
  0x16   : > { %v2163_v14 = vld [vmem:[%s2093_s24 + $0x70] sm:$0xff]  ;;  %v383_v29 = vshrl.u32 %v2119_v4, 16  ;;  %v514_v30 = vrot.slane %v386_v22, 1  ;;  %v2203_v32 = vld [vmem:[%s2093_s24 + $0x78] sm:$0xff]  ;;  %v376_v34 = vshrl.u32 %v2104_v1, 16  ;;  %v512_v35 = vrot.slane %v379_v26, 1 }
  0x17   : > { %v511_v23 = vor.u32 %v510_v18, %v369_v17  ;;  %v509_v24 = vor.u32 %v508_v20, %v362_v19  ;;  %s2034_s5 = smov 8   ;;  %v517_v36 = vor.u32 %v516_v28, %v390_v27  ;;  %v414_v38 = vshll.u32 %v2134_v7, 16 }
  0x18   : > { %v515_v37 = vor.u32 %v514_v30, %v383_v29  ;;  %v407_v39 = vshll.u32 %v2137_v8, 16  ;;  %v513_v40 = vor.u32 %v512_v35, %v376_v34  ;;  %v400_v41 = vshll.u32 %v2116_v3, 16 }
  0x19   : > { %v560_v31 = vsel %vm2189_vm2, %v511_v23, 0  ;;  %v559_v33 = vsel %vm2189_vm2, %v509_v24, 0  ;;  %v563_v42 = vsel %vm2189_vm2, %v517_v36, 0  ;;  %v411_v44 = vshrl.u32 %v2134_v7, 16 }
  0x1a   : > { %v562_v43 = vsel %vm2189_vm2, %v515_v37, 0  ;;  %v522_v45 = vrot.slane %v414_v38, 1  ;;  %v404_v46 = vshrl.u32 %v2137_v8, 16  ;;  %v520_v47 = vrot.slane %v407_v39, 1 }
  0x1b   : > { %585 = vrot.lane.b32.xlu2 %v2116_v3, %s2033_s4  ;;  %581 = vrot.lane.b32.xlu1 %v2119_v4, %s2033_s4  ;;  %v561_v48 = vsel %vm2189_vm2, %v513_v40, 0  ;;  %v397_v49 = vshrl.u32 %v2116_v3, 16  ;;  %v518_v50 = vrot.slane %v400_v41, 1  ;;  %v435_v51 = vshll.u32 %v2149_v10, 16 }
  0x1c   : > { %577 = vrot.lane.b32.xlu0 %v2122_v5, %s2033_s4  ;;  %v428_v52 = vshll.u32 %v2152_v11, 16  ;;  %v523_v53 = vor.u32 %v522_v45, %v411_v44  ;;  %v521_v54 = vor.u32 %v520_v47, %v404_v46  ;;  %v421_v56 = vshll.u32 %v2131_v6, 16 }
  0x1d   : > { %v519_v55 = vor.u32 %v518_v50, %v397_v49  ;;  %v432_v57 = vshrl.u32 %v2149_v10, 16  ;;  %v528_v58 = vrot.slane %v435_v51, 1  ;;  %v425_v59 = vshrl.u32 %v2152_v11, 16 }
  0x1e   : > { %v526_v60 = vrot.slane %v428_v52, 1  ;;  %v566_v61 = vsel %vm2189_vm2, %v523_v53, 0  ;;  %v565_v62 = vsel %vm2189_vm2, %v521_v54, 0  ;;  %v392_v63 = vrot.slane %v390_v27, 7 }
  0x1f   : > { %v564_v3 = vsel %vm2189_vm2, %v519_v55, 0  ;;  %v418_v18 = vshrl.u32 %v2131_v6, 16  ;;  %v524_v20 = vrot.slane %v421_v56, 1  ;;  %v399_v23 = vrot.slane %v397_v49, 7 }
  0x20   : > { %v529_v24 = vor.u32 %v528_v58, %v432_v57  ;;  %v527_v28 = vor.u32 %v526_v60, %v425_v59  ;;  %v456_v27 = vshll.u32 %v2166_v15, 16  ;;  %v449_v30 = vshll.u32 %v2169_v16, 16 }
  0x21   : > { %v402_v35 = vor.u32 %v400_v41, %v399_v23  ;;  %v453_v40 = vshrl.u32 %v2166_v15, 16  ;;  %v420_v47 = vrot.slane %v418_v18, 7  ;;  %v470_v50 = vshll.u32 %v2203_v32, 16 }
  0x22   : > { %v569_v36 = vsel %vm2189_vm2, %v529_v24, 0  ;;  %v568_v37 = vsel %vm2189_vm2, %v527_v28, 0  ;;  %v532_v45 = vrot.slane %v449_v30, 1  ;;  %v463_v54 = vshll.u32 %v2163_v14, 16 }
  0x23   : > { %591 = vrot.lane.b32.xlu2 %v2131_v6, %s2033_s4  ;;  %589 = vrot.lane.b32.xlu1 %v2134_v7, %s2033_s4  ;;  %v442_v6 = vshll.u32 %v2146_v9, 16  ;;  %v467_v60 = vshrl.u32 %v2203_v32, 16  ;;  %v497_v25 = vsel %vm2310_vm5, 0, %v402_v35 }
  0x24   : > { %587 = vrot.lane.b32.xlu0 %v2137_v8, %s2033_s4  ;;  %v427_v8 = vrot.slane %v425_v59, 7 }
  0x25   : > { %v530_v41 = vrot.slane %v442_v6, 1 }
  0x26   : > { %v430_v59 = vor.u32 %v428_v52, %v427_v8 }
  0x2b   : > { %597 = vrot.lane.b32.xlu2 %v2146_v9, %s2033_s4  ;;  %595 = vrot.lane.b32.xlu1 %v2149_v10, %s2033_s4 }
  0x2c   : > { %593 = vrot.lane.b32.xlu0 %v2152_v11, %s2033_s4 }
  0x33   : > { %603 = vrot.lane.b32.xlu2 %v2163_v14, %s2033_s4  ;;  %601 = vrot.lane.b32.xlu1 %v2166_v15, %s2033_s4  ;;  %v406_v15 = vrot.slane %v404_v46, 7 }
  0x34   : > { %599 = vrot.lane.b32.xlu0 %v2169_v16, %s2033_s4 }
  0x3b   : > { %625 = vrot.lane.b32.xlu2 %v560_v31, %s2034_s5  ;;  %623 = vrot.lane.b32.xlu1 %v559_v33, %s2034_s5  ;;  %v525_v31 = vor.u32 %v524_v20, %v418_v18  ;;  %v2269_v33 = vor.u32 %v393_v21, %v392_v63  ;;  %v439_v21 = vshrl.u32 %v2146_v9, 16  ;;  %v423_v9 = vor.u32 %v421_v56, %v420_v47 }
  0x3c   : > { %605 = vrot.lane.b32.xlu0 %v2203_v32, %s2033_s4  ;;  %v460_v63 = vshrl.u32 %v2163_v14, 16 }
  0x3d   : > { %v567_v0 = vsel %vm2189_vm2, %v525_v31, 0  ;;  %v531_v53 = vor.u32 %v530_v41, %v439_v21  ;;  %v441_v18 = vrot.slane %v439_v21, 7 }
  0x3e   : > { %v462_v28 = vrot.slane %v460_v63, 7 }
  0x3f   : > { %v444_v23 = vor.u32 %v442_v6, %v441_v18 }
  0x40   : > { %v465_v14 = vor.u32 %v463_v54, %v462_v28  ;;  %v496_v28 = vsel %vm2310_vm5, 0, %v2269_v33  ;;  %v364_v33 = vrot.slane %v362_v19, 7 }
  0x41   : > { %v503_v41 = vsel %vm2310_vm5, 0, %v444_v23 }
  0x42   : > { %v506_v6 = vsel %vm2310_vm5, 0, %v465_v14 }
  0x43   : > { %631 = vrot.lane.b32.xlu2 %v563_v42, %s2034_s5  ;;  %629 = vrot.lane.b32.xlu1 %v562_v43, %s2034_s5  ;;  %v534_v42 = vrot.slane %v456_v27, 1  ;;  %v446_v43 = vshrl.u32 %v2169_v16, 16 }
  0x44   : > { %627 = vrot.lane.b32.xlu0 %v561_v48, %s2034_s5 }
  0x45   : > { %v535_v48 = vor.u32 %v534_v42, %v453_v40  ;;  %v533_v49 = vor.u32 %v532_v45, %v446_v43  ;;  %v500_v45 = vsel %vm2310_vm5, 0, %v423_v9  ;;  %v448_v11 = vrot.slane %v446_v43, 7 }
  0x47   : > { %v572_v55 = vsel %vm2189_vm2, %v535_v48, 0  ;;  %v571_v58 = vsel %vm2189_vm2, %v533_v49, 0 }
  0x4b   : > { %637 = vrot.lane.b32.xlu2 %v566_v61, %s2034_s5  ;;  %635 = vrot.lane.b32.xlu1 %v565_v62, %s2034_s5  ;;  %v538_v61 = vrot.slane %v470_v50, 1  ;;  %v570_v62 = vsel %vm2189_vm2, %v531_v53, 0  ;;  %v469_v53 = vrot.slane %v467_v60, 7 }
  0x4c   : > { %633 = vrot.lane.b32.xlu0 %v564_v3, %s2034_s5  ;;  %v536_v3 = vrot.slane %v463_v54, 1  ;;  %v371_v54 = vrot.slane %v369_v17, 7 }
  0x4d   : > { %v539_v56 = vor.u32 %v538_v61, %v467_v60 }
  0x4e   : > { %v537_v20 = vor.u32 %v536_v3, %v460_v63 }
  0x4f   : > { %v574_v32 = vsel %vm2189_vm2, %v539_v56, 0 }
  0x50   : > { %v573_v24 = vsel %vm2189_vm2, %v537_v20, 0 }
  0x53   : > { %643 = vrot.lane.b32.xlu2 %v569_v36, %s2034_s5  ;;  %641 = vrot.lane.b32.xlu1 %v568_v37, %s2034_s5 }
  0x54   : > { %639 = vrot.lane.b32.xlu0 %v567_v0, %s2034_s5 }
  0x5b   : > { %649 = vrot.lane.b32.xlu2 %v572_v55, %s2034_s5  ;;  %647 = vrot.lane.b32.xlu1 %v571_v58, %s2034_s5  ;;  %v2335_v55 = vor.u32 %v470_v50, %v469_v53 }
  0x5c   : > { %645 = vrot.lane.b32.xlu0 %v570_v62, %s2034_s5  ;;  %v374_v62 = vor.u32 %v372_v12, %v371_v54  ;;  %v434_v54 = vrot.slane %v432_v57, 7 }
  0x5d   : > { %v507_v3 = vsel %vm2310_vm5, 0, %v2335_v55 }
  0x5e   : > { %v493_v60 = vsel %vm2310_vm5, 0, %v374_v62  ;;  %v367_v62 = vor.u32 %v365_v13, %v364_v33  ;;  %v437_v19 = vor.u32 %v435_v51, %v434_v54  ;;  %v378_v13 = vrot.slane %v376_v34, 7 }
  0x5f   : > { %v409_v54 = vor.u32 %v407_v39, %v406_v15 }
  0x60   : > { %v492_v2 = vsel %vm2310_vm5, 0, %v367_v62  ;;  %v502_v10 = vsel %vm2310_vm5, 0, %v437_v19 }
  0x61   : > { %v498_v39 = vsel %vm2310_vm5, 0, %v409_v54 }
  0x63   : > { %653 = vrot.lane.b32.xlu1 %v574_v32, %s2034_s5 }
  0x64   : > { %651 = vrot.lane.b32.xlu0 %v573_v24, %s2034_s5  ;;  %v413_v24 = vrot.slane %v411_v44, 7 }
  0x6d   : > { %v584_v36 = vpop.permute.xlu2 %583 }
  0x6e   : > { %v670_v14 = vsel %vm655_vm6, %v496_v28, %v584_v36 }
  0x75   : > { %v586_v37 = vpop.permute.xlu2 %585 }
  0x76   : > { %v2319_v42 = vsel %vm655_vm6, %v497_v25, %v586_v37  ;;  %v416_v37 = vor.u32 %v414_v38, %v413_v24 }
  0x78   : > { %v499_v36 = vsel %vm2310_vm5, 0, %v416_v37 }
  0x7d   : > { %v592_v0 = vpop.permute.xlu2 %591 }
  0x7e   : > { %v2324_v21 = vsel %vm655_vm6, %v500_v45, %v592_v0 }
  0x85   : > { %v598_v47 = vpop.permute.xlu2 %597  ;;  %v2328_v48 = vpop.permute.xlu1 %579 }
  0x86   : > { %v2331_v35 = vsel %vm655_vm6, %v503_v41, %v598_v47  ;;  %v576_v49 = vpop.permute.xlu0 %575 }
  0x87   : > { %v658_v51 = vsel %vm655_vm6, %v492_v2, %v576_v49 }
  0x8d   : > { %v604_v9 = vpop.permute.xlu2 %603  ;;  %v2337_v58 = vpop.permute.xlu1 %581 }
  0x8e   : > { %v2340_v61 = vsel %vm655_vm6, %v506_v6, %v604_v9  ;;  %v578_v63 = vpop.permute.xlu0 %577 }
  0x8f   : > { %v661_v17 = vsel %vm655_vm6, %v493_v60, %v578_v63 }
  0x95   : > { %v590_v50 = vpop.permute.xlu1 %589  ;;  %v626_v18 = vpop.permute.xlu2 %625 }
  0x96   : > { %v708_v56 = vsel %vm704_vm7, %v661_v17, %v626_v18  ;;  %v2351_v20 = vpop.permute.xlu0 %587  ;;  %v679_v7 = vsel %vm655_vm6, %v499_v36, %v590_v50  ;;  %v455_v50 = vrot.slane %v453_v40, 7 }
  0x97   : > { %v761_v23 = vunpack.c.l.b16 %v708_v56  ;;  %v762_v5 = vunpack.c.h.b16 %v708_v56 }
  0x99   : > { %v793_v12 = vpack.c.b16 %v761_v23, %v761_v23  ;;  %v794_v32 = vpack.c.b16 %v762_v5, %v762_v5  ;;  %v385_v23 = vrot.slane %v383_v29, 7 }
  0x9b   : > { %858 = vst.msk [vmem:[#allocation2 + $0x10] sm:$0xf] %vm737_vm8, %v793_v12  ;;  %v388_v40 = vor.u32 %v386_v22, %v385_v23 }
  0x9c   : > { %859 = vst.msk [vmem:[#allocation2 + $0x14] sm:$0xf] %vm737_vm8, %v794_v32  ;;  %v458_v32 = vor.u32 %v456_v27, %v455_v50 }
  0x9d   : > { %v596_v6 = vpop.permute.xlu1 %595  ;;  %v632_v25 = vpop.permute.xlu2 %631  ;;  %v495_v22 = vsel %vm2310_vm5, 0, %v388_v40 }
  0x9e   : > { %v714_v45 = vsel %vm704_vm7, %v670_v14, %v632_v25  ;;  %v2364_v0 = vpop.permute.xlu0 %593  ;;  %v688_v29 = vsel %vm655_vm6, %v502_v10, %v596_v6  ;;  %v381_v14 = vor.u32 %v379_v26, %v378_v13  ;;  %v505_v27 = vsel %vm2310_vm5, 0, %v458_v32 }
  0x9f   : > { %v767_v44 = vunpack.c.l.b16 %v714_v45  ;;  %v768_v41 = vunpack.c.h.b16 %v714_v45  ;;  %v667_v26 = vsel %vm655_vm6, %v495_v22, %v2337_v58  ;;  %v676_v10 = vsel %vm655_vm6, %v498_v39, %v2351_v20 }
  0xa0   : > { %v494_v1 = vsel %vm2310_vm5, 0, %v381_v14 }
  0xa1   : > { %v799_v47 = vpack.c.b16 %v767_v44, %v767_v44  ;;  %v800_v53 = vpack.c.b16 %v768_v41, %v768_v41  ;;  %v664_v33 = vsel %vm655_vm6, %v494_v1, %v2328_v48 }
  0xa3   : > { %864 = vst.msk [vmem:[#allocation2 + $0x28] sm:$0xf] %vm737_vm8, %v799_v47 }
  0xa4   : > { %865 = vst.msk [vmem:[#allocation2 + $0x2c] sm:$0xf] %vm737_vm8, %v800_v53 }
  0xa5   : > { %v602_v38 = vpop.permute.xlu1 %601  ;;  %v638_v9 = vpop.permute.xlu2 %637 }
  0xa6   : > { %v720_v63 = vsel %vm704_vm7, %v679_v7, %v638_v9  ;;  %v2380_v57 = vpop.permute.xlu0 %599  ;;  %v697_v47 = vsel %vm655_vm6, %v505_v27, %v602_v38 }
  0xa7   : > { %v773_v60 = vunpack.c.l.b16 %v720_v63  ;;  %v774_v17 = vunpack.c.h.b16 %v720_v63 }
  0xa9   : > { %v805_v18 = vpack.c.b16 %v773_v60, %v773_v60  ;;  %v806_v56 = vpack.c.b16 %v774_v17, %v774_v17 }
  0xab   : > { %870 = vst.msk [vmem:[#allocation2 + $0x40] sm:$0xf] %vm737_vm8, %v805_v18 }
  0xac   : > { %871 = vst.msk [vmem:[#allocation2 + $0x44] sm:$0xf] %vm737_vm8, %v806_v56 }
  0xad   : > { %v644_v5 = vpop.permute.xlu2 %643  ;;  %v624_v12 = vpop.permute.xlu1 %623 }
  0xae   : > { %v726_v24 = vsel %vm704_vm7, %v688_v29, %v644_v5  ;;  %v2401_v28 = vpop.permute.xlu0 %605  ;;  %v706_v34 = vsel %vm704_vm7, %v658_v51, %v624_v12 }
  0xaf   : > { %v779_v49 = vunpack.c.l.b16 %v726_v24  ;;  %v780_v25 = vunpack.c.h.b16 %v726_v24  ;;  %v759_v6 = vunpack.c.l.b16 %v706_v34  ;;  %v760_v37 = vunpack.c.h.b16 %v706_v34 }
  0xb0   : > { %v2035_v24 = vmov 0   ;;  %v501_v34 = vsel %vm2310_vm5, 0, %v430_v59 }
  0xb1   : > { %v811_v45 = vpack.c.b16 %v779_v49, %v779_v49  ;;  %v812_v44 = vpack.c.b16 %v780_v25, %v780_v25  ;;  %v791_v4 = vpack.c.b16 %v759_v6, %v759_v6  ;;  %v792_v41 = vpack.c.b16 %v760_v37, %v760_v37  ;;  %738 = vst.msk [vmem:[#allocation2] sm:$0xf] %vm737_vm8, %v2035_v24 }
  0xb2   : > { %739 = vst.msk [vmem:[#allocation2 + $0x4] sm:$0xf] %vm737_vm8, %v2035_v24  ;;  %v451_v6 = vor.u32 %v449_v30, %v448_v11 }
  0xb3   : > { %876 = vst.msk [vmem:[#allocation2 + $0x58] sm:$0xf] %vm737_vm8, %v811_v45 }
  0xb4   : > { %877 = vst.msk [vmem:[#allocation2 + $0x5c] sm:$0xf] %vm737_vm8, %v812_v44  ;;  %v504_v16 = vsel %vm2310_vm5, 0, %v451_v6 }
  0xb5   : > { %856 = vst.msk [vmem:[#allocation2 + $0x8] sm:$0xf] %vm737_vm8, %v791_v4  ;;  %v650_v46 = vpop.permute.xlu2 %649  ;;  %v630_v53 = vpop.permute.xlu1 %629 }
  0xb6   : > { %857 = vst.msk [vmem:[#allocation2 + $0xc] sm:$0xf] %vm737_vm8, %v792_v41  ;;  %v732_v36 = vsel %vm704_vm7, %v697_v47, %v650_v46  ;;  %v628_v7 = vpop.permute.xlu0 %627  ;;  %v712_v9 = vsel %vm704_vm7, %v667_v26, %v630_v53 }
  0xb7   : > { %v785_v58 = vunpack.c.l.b16 %v732_v36  ;;  %v786_v62 = vunpack.c.h.b16 %v732_v36  ;;  %v710_v38 = vsel %vm704_vm7, %v664_v33, %v628_v7  ;;  %v765_v19 = vunpack.c.l.b16 %v712_v9  ;;  %741 = vst.msk [vmem:[#allocation2 + $0x88] sm:$0xf] %vm737_vm8, %v2035_v24 }
  0xb8   : > { %v763_v63 = vunpack.c.l.b16 %v710_v38  ;;  %v764_v60 = vunpack.c.h.b16 %v710_v38  ;;  %v766_v17 = vunpack.c.h.b16 %v712_v9  ;;  %742 = vst.msk [vmem:[#allocation2 + $0x8c] sm:$0xf] %vm737_vm8, %v2035_v24 }
  0xb9   : > { %v817_v18 = vpack.c.b16 %v785_v58, %v785_v58  ;;  %v818_v48 = vpack.c.b16 %v786_v62, %v786_v62  ;;  %v797_v50 = vpack.c.b16 %v765_v19, %v765_v19 }
  0xba   : > { %v795_v56 = vpack.c.b16 %v763_v63, %v763_v63  ;;  %v796_v23 = vpack.c.b16 %v764_v60, %v764_v60  ;;  %v798_v2 = vpack.c.b16 %v766_v17, %v766_v17 }
  0xbb   : > { %882 = vst.msk [vmem:[#allocation2 + $0x70] sm:$0xf] %vm737_vm8, %v817_v18 }
  0xbc   : > { %883 = vst.msk [vmem:[#allocation2 + $0x74] sm:$0xf] %vm737_vm8, %v818_v48 }
  0xbd   : > { %860 = vst.msk [vmem:[#allocation2 + $0x18] sm:$0xf] %vm737_vm8, %v795_v56  ;;  %v636_v13 = vpop.permute.xlu1 %635 }
  0xbe   : > { %861 = vst.msk [vmem:[#allocation2 + $0x1c] sm:$0xf] %vm737_vm8, %v796_v23  ;;  %v634_v51 = vpop.permute.xlu0 %633  ;;  %v718_v29 = vsel %vm704_vm7, %v676_v10, %v636_v13 }
  0xbf   : > { %862 = vst.msk [vmem:[#allocation2 + $0x20] sm:$0xf] %vm737_vm8, %v797_v50  ;;  %v716_v5 = vsel %vm704_vm7, %v2319_v42, %v634_v51  ;;  %v771_v12 = vunpack.c.l.b16 %v718_v29  ;;  %v772_v40 = vunpack.c.h.b16 %v718_v29  ;;  %v685_v42 = vsel %vm655_vm6, %v501_v34, %v2364_v0 }
  0xc0   : > { %863 = vst.msk [vmem:[#allocation2 + $0x24] sm:$0xf] %vm737_vm8, %v798_v2  ;;  %v769_v20 = vunpack.c.l.b16 %v716_v5  ;;  %v770_v32 = vunpack.c.h.b16 %v716_v5 }
  0xc1   : > { %v803_v52 = vpack.c.b16 %v771_v12, %v771_v12  ;;  %v804_v25 = vpack.c.b16 %v772_v40, %v772_v40 }
  0xc2   : > { %v801_v14 = vpack.c.b16 %v769_v20, %v769_v20  ;;  %v802_v49 = vpack.c.b16 %v770_v32, %v770_v32 }
  0xc3   : > { %868 = vst.msk [vmem:[#allocation2 + $0x38] sm:$0xf] %vm737_vm8, %v803_v52 }
  0xc4   : > { %866 = vst.msk [vmem:[#allocation2 + $0x30] sm:$0xf] %vm737_vm8, %v801_v14 }
  0xc5   : > { %867 = vst.msk [vmem:[#allocation2 + $0x34] sm:$0xf] %vm737_vm8, %v802_v49  ;;  %v642_v43 = vpop.permute.xlu1 %641 }
  0xc6   : > { %869 = vst.msk [vmem:[#allocation2 + $0x3c] sm:$0xf] %vm737_vm8, %v804_v25  ;;  %v640_v37 = vpop.permute.xlu0 %639  ;;  %v724_v45 = vsel %vm704_vm7, %v685_v42, %v642_v43 }
  0xc7   : > { %v722_v44 = vsel %vm704_vm7, %v2324_v21, %v640_v37  ;;  %v777_v4 = vunpack.c.l.b16 %v724_v45  ;;  %v778_v15 = vunpack.c.h.b16 %v724_v45  ;;  %v694_v21 = vsel %vm655_vm6, %v504_v16, %v2380_v57 }
  0xc8   : > { %v775_v22 = vunpack.c.l.b16 %v722_v44  ;;  %v776_v0 = vunpack.c.h.b16 %v722_v44  ;;  %v703_v57 = vsel %vm655_vm6, %v507_v3, %v2401_v28 }
  0xc9   : > { %v809_v27 = vpack.c.b16 %v777_v4, %v777_v4  ;;  %v810_v1 = vpack.c.b16 %v778_v15, %v778_v15 }
  0xca   : > { %v807_v30 = vpack.c.b16 %v775_v22, %v775_v22  ;;  %v808_v41 = vpack.c.b16 %v776_v0, %v776_v0 }
  0xcb   : > { %874 = vst.msk [vmem:[#allocation2 + $0x50] sm:$0xf] %vm737_vm8, %v809_v27 }
  0xcc   : > { %872 = vst.msk [vmem:[#allocation2 + $0x48] sm:$0xf] %vm737_vm8, %v807_v30 }
  0xcd   : > { %873 = vst.msk [vmem:[#allocation2 + $0x4c] sm:$0xf] %vm737_vm8, %v808_v41  ;;  %v648_v26 = vpop.permute.xlu1 %647 }
  0xce   : > { %875 = vst.msk [vmem:[#allocation2 + $0x54] sm:$0xf] %vm737_vm8, %v810_v1  ;;  %v646_v47 = vpop.permute.xlu0 %645  ;;  %v730_v46 = vsel %vm704_vm7, %v694_v21, %v648_v26 }
  0xcf   : > { %v728_v53 = vsel %vm704_vm7, %v2331_v35, %v646_v47  ;;  %v783_v33 = vunpack.c.l.b16 %v730_v46  ;;  %v784_v54 = vunpack.c.h.b16 %v730_v46 }
  0xd0   : > { %v781_v36 = vunpack.c.l.b16 %v728_v53  ;;  %v782_v7 = vunpack.c.h.b16 %v728_v53 }
  0xd1   : > { %v815_v9 = vpack.c.b16 %v783_v33, %v783_v33  ;;  %v816_v38 = vpack.c.b16 %v784_v54, %v784_v54 }
  0xd2   : > { %v813_v58 = vpack.c.b16 %v781_v36, %v781_v36  ;;  %v814_v62 = vpack.c.b16 %v782_v7, %v782_v7 }
  0xd3   : > { %880 = vst.msk [vmem:[#allocation2 + $0x68] sm:$0xf] %vm737_vm8, %v815_v9 }
  0xd4   : > { %878 = vst.msk [vmem:[#allocation2 + $0x60] sm:$0xf] %vm737_vm8, %v813_v58 }
  0xd5   : > { %879 = vst.msk [vmem:[#allocation2 + $0x64] sm:$0xf] %vm737_vm8, %v814_v62  ;;  %v654_v35 = vpop.permute.xlu1 %653 }
  0xd6   : > { %881 = vst.msk [vmem:[#allocation2 + $0x6c] sm:$0xf] %vm737_vm8, %v816_v38  ;;  %v652_v19 = vpop.permute.xlu0 %651  ;;  %v736_v63 = vsel %vm704_vm7, %v703_v57, %v654_v35 }
  0xd7   : > { %v734_v60 = vsel %vm704_vm7, %v2340_v61, %v652_v19  ;;  %v789_v17 = vunpack.c.l.b16 %v736_v63  ;;  %v790_v18 = vunpack.c.h.b16 %v736_v63 }
  0xd8   : > { %v787_v48 = vunpack.c.l.b16 %v734_v60  ;;  %v788_v8 = vunpack.c.h.b16 %v734_v60 }
  0xd9   : > { %v821_v31 = vpack.c.b16 %v789_v17, %v789_v17  ;;  %v822_v56 = vpack.c.b16 %v790_v18, %v790_v18 }
  0xda   : > { %v819_v39 = vpack.c.b16 %v787_v48, %v787_v48  ;;  %v820_v55 = vpack.c.b16 %v788_v8, %v788_v8 }
  0xdb   : > { %886 = vst.msk [vmem:[#allocation2 + $0x80] sm:$0xf] %vm737_vm8, %v821_v31 }
  0xdc   : > { %884 = vst.msk [vmem:[#allocation2 + $0x78] sm:$0xf] %vm737_vm8, %v819_v39 }
  0xdd   : > { %885 = vst.msk [vmem:[#allocation2 + $0x7c] sm:$0xf] %vm737_vm8, %v820_v55 }
  0xde   : > { %887 = vst.msk [vmem:[#allocation2 + $0x84] sm:$0xf] %vm737_vm8, %v822_v56 }
  0xdf PF: > { %v1757_v61 = vld [vmem:[%s2681_s1] sm:$0xf]  ;;  %v1925_v3 = vld [vmem:[%s2681_s1] sm:$0x30]  ;;  %vm980_vm9 = vcmask 1045504   ;;  %s1916_s10 = sshll.u32 %s2015_s12, 6 }
  0xe0   : > { %v1758_v28 = vor.u32 %v1925_v3, %v1757_v61  ;;  %v1821_v23 = vld [vmem:[%s2681_s1 + $0x8] sm:$0xf]  ;;  %v1935_v50 = vld [vmem:[%s2681_s1 + $0x8] sm:$0x30]  ;;  %s2505_s21 = scalar_lea.vmem [#allocation2], %s1916_s10  ;;  %vm955_vm10 = vcmask 97280  }
  0xe1   : > { %v1822_v2 = vor.u32 %v1935_v50, %v1821_v23  ;;  %v1885_v51 = vld [vmem:[%s2681_s1 + $0x10] sm:$0xf]  ;;  %v1945_v29 = vld [vmem:[%s2681_s1 + $0x10] sm:$0x30]  ;;  %vm1033_vm11 = vcmask 31744  }
  0xe2   : > { %v982_v13 = vsel %vm980_vm9, %v1758_v28, 0  ;;  %v1886_v40 = vor.u32 %v1945_v29, %v1885_v51  ;;  %v2576_v60 = vld [vmem:[%s2682_s2] ss:$0 sm:$0xff] }
  0xe3   : > { %991 = vmatpush.bf16.msra.mxu0 %v982_v13  ;;  %1946 = vmatpush.bf16.msra.mxu3 %v982_v13  ;;  %v1143_v5 = vsel %vm980_vm9, %v1822_v2, 0 }
  0xe4   : > { %1152 = vmatpush.bf16.msra.mxu1 %v1143_v5  ;;  %v1335_v20 = vsel %vm980_vm9, %v1886_v40, 0 }
  0xe5   : > { %v1917_v10 = vld [vmem:[%s2505_s21] sm:$0xff]  ;;  %v1923_v59 = vld [vmem:[%s2505_s21 + $0x30] sm:$0xff]  ;;  %v1927_v12 = vld [vmem:[%s2505_s21 + $0x8] sm:$0xff]  ;;  %1344 = vmatpush.bf16.msra.mxu2 %v1335_v20 }
  0xe6   : > { %1759 = vmatmul.msk.bf16.vlgmr.msra.gmra.mxu0 %vm955_vm10, %v1917_v10  ;;  %1765 = vmatmul.msk.bf16.vlgmr.msra.gmra.mxu3 %vm955_vm10, %v1923_v59  ;;  %v1937_v32 = vld [vmem:[%s2505_s21 + $0x10] sm:$0xff]  ;;  %v1918_v11 = vld [vmem:[%s2505_s21 + $0x8] sm:$0xff]  ;;  %v1924_v52 = vld [vmem:[%s2505_s21 + $0x38] sm:$0xff] }
  0xe7   : > { %1947 = vmatpush.bf16.msrb.mxu3 %v1143_v5  ;;  %1823 = vmatmul.msk.bf16.vlgmr.msra.gmra.mxu1 %vm955_vm10, %v1927_v12  ;;  %v1928_v24 = vld [vmem:[%s2505_s21 + $0x10] sm:$0xff]  ;;  %v1938_v34 = vld [vmem:[%s2505_s21 + $0x18] sm:$0xff]  ;;  %v1939_v42 = vld [vmem:[%s2505_s21 + $0x20] sm:$0xff] }
  0xe8   : > { %1887 = vmatmul.msk.bf16.vlgmr.msra.gmra.mxu2 %vm955_vm10, %v1937_v32  ;;  %v1919_v14 = vld [vmem:[%s2505_s21 + $0x10] sm:$0xff]  ;;  %v1933_v49 = vld [vmem:[%s2505_s21 + $0x38] sm:$0xff]  ;;  %v1934_v6 = vld [vmem:[%s2505_s21 + $0x40] sm:$0xff] }
  0xe9   : > { %v1929_v25 = vld [vmem:[%s2505_s21 + $0x18] sm:$0xff]  ;;  %v1930_v37 = vld [vmem:[%s2505_s21 + $0x20] sm:$0xff]  ;;  %v1940_v45 = vld [vmem:[%s2505_s21 + $0x28] sm:$0xff] }
  0xea   : > { %v1920_v43 = vld [vmem:[%s2505_s21 + $0x18] sm:$0xff]  ;;  %v1921_v44 = vld [vmem:[%s2505_s21 + $0x20] sm:$0xff]  ;;  %v1931_v15 = vld [vmem:[%s2505_s21 + $0x28] sm:$0xff] }
  0xeb   : > { %1948 = vmatpush.bf16.msra.mxu3 %v1335_v20  ;;  %v1943_v4 = vld [vmem:[%s2505_s21 + $0x40] sm:$0xff]  ;;  %v1941_v22 = vld [vmem:[%s2505_s21 + $0x30] sm:$0xff]  ;;  %v1922_v0 = vld [vmem:[%s2505_s21 + $0x28] sm:$0xff] }
  0xec   : > { %v1944_v27 = vld [vmem:[%s2505_s21 + $0x48] sm:$0xff]  ;;  %v1932_v16 = vld [vmem:[%s2505_s21 + $0x30] sm:$0xff]  ;;  %v1942_v30 = vld [vmem:[%s2505_s21 + $0x38] sm:$0xff] }
  0xf6   : > { %1760 = vmatmul.msk.bf16.gmra.mxu0 %vm955_vm10, %v1918_v11  ;;  %1766 = vmatmul.msk.bf16.gmra.mxu3 %vm955_vm10, %v1924_v52 }
  0xf7   : > { %1824 = vmatmul.msk.bf16.gmra.mxu1 %vm955_vm10, %v1928_v24 }
  0xf8   : > { %1888 = vmatmul.msk.bf16.gmra.mxu2 %vm955_vm10, %v1938_v34 }
 0x106   : > { %1761 = vmatmul.msk.bf16.gmra.mxu0 %vm955_vm10, %v1919_v14  ;;  %1829 = vmatmul.msk.bf16.vlgmr.msrb.gmra.mxu3 %vm955_vm10, %v1933_v49 }
 0x107   : > { %1825 = vmatmul.msk.bf16.gmra.mxu1 %vm955_vm10, %v1929_v25 }
 0x108   : > { %1889 = vmatmul.msk.bf16.gmra.mxu2 %vm955_vm10, %v1939_v42 }
 0x116   : > { %1762 = vmatmul.msk.bf16.gmra.mxu0 %vm955_vm10, %v1920_v43  ;;  %1830 = vmatmul.msk.bf16.gmra.mxu3 %vm955_vm10, %v1934_v6 }
 0x117   : > { %1826 = vmatmul.msk.bf16.gmra.mxu1 %vm955_vm10, %v1930_v37 }
 0x118   : > { %1890 = vmatmul.msk.bf16.gmra.mxu2 %vm955_vm10, %v1940_v45 }
 0x126   : > { %1763 = vmatmul.msk.bf16.gmra.mxu0 %vm955_vm10, %v1921_v44  ;;  %1893 = vmatmul.msk.bf16.vlgmr.msra.gmra.mxu3 %vm955_vm10, %v1943_v4 }
 0x127   : > { %1827 = vmatmul.msk.bf16.gmra.mxu1 %vm955_vm10, %v1931_v15 }
 0x128   : > { %1891 = vmatmul.msk.bf16.gmra.mxu2 %vm955_vm10, %v1941_v22 }
 0x136   : > { %1764 = vmatmul.msk.bf16.gmra.mxu0 %vm955_vm10, %v1922_v0  ;;  %1894 = vmatmul.msk.bf16.gmra.mxu3 %vm955_vm10, %v1944_v27 }
 0x137   : > { %1828 = vmatmul.msk.bf16.gmra.mxu1 %vm955_vm10, %v1932_v16 }
 0x138   : > { %1892 = vmatmul.msk.bf16.gmra.mxu2 %vm955_vm10, %v1942_v30 }
 0x163   : > { %v993_v41 = vpop.f32.mrf.mxu0 }
 0x164   : > { %1034 = vst.msk [vmem:[#allocation3] sm:$0xff] %vm1033_vm11, %v993_v41  ;;  %v1154_v1 = vpop.f32.mrf.mxu1 }
 0x169   : > { %v1023_v21 = vpop.f32.mrf.mxu3 }
 0x16a   : > { %1046 = vst.msk [vmem:[#allocation3 + $0x60] sm:$0xff] %vm1033_vm11, %v1023_v21 }
 0x16b   : > { %v1194_v26 = vld [vmem:[#allocation3] sm:$0xff]  ;;  %v995_v47 = vpop.f32.mrf.mxu0  ;;  %v1346_v33 = vpop.f32.mrf.mxu2 }
 0x16c   : > { %v1210_v46 = vadd.f32 %v1194_v26, %v1154_v1  ;;  %1035 = vst.msk [vmem:[#allocation3 + $0x8] sm:$0xff] %vm1033_vm11, %v995_v47  ;;  %v1156_v53 = vpop.f32.mrf.mxu1 }
 0x16e   : > { %1226 = vst.msk [vmem:[#allocation3] sm:$0xff] %vm1033_vm11, %v1210_v46 }
 0x171   : > { %v1025_v54 = vpop.f32.mrf.mxu3  ;;  %v1206_v5 = vld [vmem:[#allocation3 + $0x60] sm:$0xff] }
 0x172   : > { %1047 = vst.msk [vmem:[#allocation3 + $0x68] sm:$0xff] %vm1033_vm11, %v1025_v54 }
 0x173   : > { %v1195_v36 = vld [vmem:[#allocation3 + $0x8] sm:$0xff]  ;;  %v998_v7 = vpop.f32.mrf.mxu0  ;;  %v1348_v38 = vpop.f32.mrf.mxu2 }
 0x174   : > { %v1211_v9 = vadd.f32 %v1195_v36, %v1156_v53  ;;  %1036 = vst.msk [vmem:[#allocation3 + $0x10] sm:$0xff] %vm1033_vm11, %v998_v7  ;;  %v1159_v58 = vpop.f32.mrf.mxu1 }
 0x175   : > { %v1386_v62 = vld [vmem:[#allocation3] sm:$0xff] }
 0x176   : > { %1227 = vst.msk [vmem:[#allocation3 + $0x8] sm:$0xff] %vm1033_vm11, %v1211_v9  ;;  %v1402_v57 = vadd.f32 %v1386_v62, %v1346_v33 }
 0x178   : > { %1418 = vst.msk [vmem:[#allocation3] sm:$0xff] %vm1033_vm11, %v1402_v57 }
 0x179   : > { %v1028_v35 = vpop.f32.mrf.mxu3  ;;  %v1207_v43 = vld [vmem:[#allocation3 + $0x68] sm:$0xff] }
 0x17a   : > { %1048 = vst.msk [vmem:[#allocation3 + $0x70] sm:$0xff] %vm1033_vm11, %v1028_v35 }
 0x17b   : > { %v1196_v19 = vld [vmem:[#allocation3 + $0x10] sm:$0xff]  ;;  %v1000_v63 = vpop.f32.mrf.mxu0  ;;  %v1351_v8 = vpop.f32.mrf.mxu2 }
 0x17c   : > { %v1212_v17 = vadd.f32 %v1196_v19, %v1159_v58  ;;  %1037 = vst.msk [vmem:[#allocation3 + $0x18] sm:$0xff] %vm1033_vm11, %v1000_v63  ;;  %v1161_v18 = vpop.f32.mrf.mxu1 }
 0x17d   : > { %v1387_v48 = vld [vmem:[#allocation3 + $0x8] sm:$0xff] }
 0x17e   : > { %1228 = vst.msk [vmem:[#allocation3 + $0x10] sm:$0xff] %vm1033_vm11, %v1212_v17  ;;  %v1403_v31 = vadd.f32 %v1387_v48, %v1348_v38 }
 0x17f   : > { %v1434_v39 = vld [vmem:[#allocation3] sm:$0xff] }
 0x180   : > { %v1454_v55 = vadd.f32 %v2576_v60, %v1434_v39  ;;  %1419 = vst.msk [vmem:[#allocation3 + $0x8] sm:$0xff] %vm1033_vm11, %v1403_v31 }
 0x181   : > { %v1030_v56 = vpop.f32.mrf.mxu3  ;;  %v1208_v1 = vld [vmem:[#allocation3 + $0x70] sm:$0xff] }
 0x182   : > { %v1470_v61 = vmax.f32 %v1454_v55, 0.0  ;;  %1049 = vst.msk [vmem:[#allocation3 + $0x78] sm:$0xff] %vm1033_vm11, %v1030_v56 }
 0x183   : > { %v1197_v3 = vld [vmem:[#allocation3 + $0x18] sm:$0xff]  ;;  %v1003_v28 = vpop.f32.mrf.mxu0  ;;  %v1353_v10 = vpop.f32.mrf.mxu2 }
 0x184   : > { %1486 = vst.msk [vmem:[%s2098_s30] sm:$0xff] %vm1033_vm11, %v1470_v61  ;;  %v1213_v23 = vadd.f32 %v1197_v3, %v1161_v18  ;;  %v1164_v50 = vpop.f32.mrf.mxu1 }
 0x185   : > { %v1388_v2 = vld [vmem:[#allocation3 + $0x10] sm:$0xff]  ;;  %1038 = vst.msk [vmem:[#allocation3 + $0x20] sm:$0xff] %vm1033_vm11, %v1003_v28 }
 0x186   : > { %1229 = vst.msk [vmem:[#allocation3 + $0x18] sm:$0xff] %vm1033_vm11, %v1213_v23  ;;  %v1404_v13 = vadd.f32 %v1388_v2, %v1351_v8 }
 0x187   : > { %v1435_v59 = vld [vmem:[#allocation3 + $0x8] sm:$0xff] }
 0x188   : > { %v1455_v51 = vadd.f32 %v2576_v60, %v1435_v59  ;;  %1420 = vst.msk [vmem:[#allocation3 + $0x10] sm:$0xff] %vm1033_vm11, %v1404_v13 }
 0x189   : > { %v1184_v29 = vpop.f32.mrf.mxu3  ;;  %v1209_v38 = vld [vmem:[#allocation3 + $0x78] sm:$0xff] }
 0x18a   : > { %v1471_v12 = vmax.f32 %v1455_v51, 0.0  ;;  %v1222_v40 = vadd.f32 %v1206_v5, %v1184_v29 }
 0x18b   : > { %v1005_v20 = vpop.f32.mrf.mxu0  ;;  %v1356_v34 = vpop.f32.mrf.mxu2 }
 0x18c   : > { %1487 = vst.msk [vmem:[%s2098_s30 + $0x8] sm:$0xff] %vm1033_vm11, %v1471_v12  ;;  %v1198_v32 = vld [vmem:[#allocation3 + $0x20] sm:$0xff]  ;;  %v1166_v11 = vpop.f32.mrf.mxu1 }
 0x18d   : > { %v1214_v52 = vadd.f32 %v1198_v32, %v1164_v50  ;;  %v1389_v24 = vld [vmem:[#allocation3 + $0x18] sm:$0xff]  ;;  %1238 = vst.msk [vmem:[#allocation3 + $0x60] sm:$0xff] %vm1033_vm11, %v1222_v40 }
 0x18e   : > { %v1405_v14 = vadd.f32 %v1389_v24, %v1353_v10  ;;  %1039 = vst.msk [vmem:[#allocation3 + $0x28] sm:$0xff] %vm1033_vm11, %v1005_v20 }
 0x18f   : > { %v1436_v49 = vld [vmem:[#allocation3 + $0x10] sm:$0xff]  ;;  %1230 = vst.msk [vmem:[#allocation3 + $0x20] sm:$0xff] %vm1033_vm11, %v1214_v52 }
 0x190   : > { %v1456_v25 = vadd.f32 %v2576_v60, %v1436_v49  ;;  %1421 = vst.msk [vmem:[#allocation3 + $0x18] sm:$0xff] %vm1033_vm11, %v1405_v14 }
 0x191   : > { %v1186_v42 = vpop.f32.mrf.mxu3 }
 0x192   : > { %v1472_v6 = vmax.f32 %v1456_v25, 0.0  ;;  %v1223_v37 = vadd.f32 %v1207_v43, %v1186_v42 }
 0x193   : > { %v1008_v45 = vpop.f32.mrf.mxu0  ;;  %v1358_v15 = vpop.f32.mrf.mxu2 }
 0x194   : > { %1488 = vst.msk [vmem:[%s2098_s30 + $0x10] sm:$0xff] %vm1033_vm11, %v1472_v6  ;;  %v1169_v44 = vpop.f32.mrf.mxu1  ;;  %v1398_v56 = vld [vmem:[#allocation3 + $0x60] sm:$0xff] }
 0x195   : > { %v1199_v4 = vld [vmem:[#allocation3 + $0x28] sm:$0xff]  ;;  %1239 = vst.msk [vmem:[#allocation3 + $0x68] sm:$0xff] %vm1033_vm11, %v1223_v37 }
 0x196   : > { %v1215_v22 = vadd.f32 %v1199_v4, %v1166_v11  ;;  %v1390_v0 = vld [vmem:[#allocation3 + $0x20] sm:$0xff]  ;;  %1040 = vst.msk [vmem:[#allocation3 + $0x30] sm:$0xff] %vm1033_vm11, %v1008_v45 }
 0x197   : > { %v1437_v27 = vld [vmem:[#allocation3 + $0x18] sm:$0xff]  ;;  %v1406_v16 = vadd.f32 %v1390_v0, %v1356_v34 }
 0x198   : > { %v1457_v30 = vadd.f32 %v2576_v60, %v1437_v27  ;;  %1231 = vst.msk [vmem:[#allocation3 + $0x28] sm:$0xff] %vm1033_vm11, %v1215_v22 }
 0x199   : > { %1422 = vst.msk [vmem:[#allocation3 + $0x20] sm:$0xff] %vm1033_vm11, %v1406_v16  ;;  %v1189_v41 = vpop.f32.mrf.mxu3 }
 0x19a   : > { %v1473_v21 = vmax.f32 %v1457_v30, 0.0  ;;  %v1224_v26 = vadd.f32 %v1208_v1, %v1189_v41 }
 0x19b   : > { %v1010_v47 = vpop.f32.mrf.mxu0  ;;  %v1361_v33 = vpop.f32.mrf.mxu2 }
 0x19c   : > { %1489 = vst.msk [vmem:[%s2098_s30 + $0x18] sm:$0xff] %vm1033_vm11, %v1473_v21  ;;  %v1171_v46 = vpop.f32.mrf.mxu1  ;;  %v1399_v12 = vld [vmem:[#allocation3 + $0x68] sm:$0xff] }
 0x19d   : > { %v1200_v53 = vld [vmem:[#allocation3 + $0x30] sm:$0xff]  ;;  %1240 = vst.msk [vmem:[#allocation3 + $0x70] sm:$0xff] %vm1033_vm11, %v1224_v26 }
 0x19e   : > { %v1216_v54 = vadd.f32 %v1200_v53, %v1169_v44  ;;  %1041 = vst.msk [vmem:[#allocation3 + $0x38] sm:$0xff] %vm1033_vm11, %v1010_v47 }
 0x19f   : > { %v1391_v36 = vld [vmem:[#allocation3 + $0x28] sm:$0xff] }
 0x1a0   : > { %v1438_v7 = vld [vmem:[#allocation3 + $0x20] sm:$0xff]  ;;  %1232 = vst.msk [vmem:[#allocation3 + $0x30] sm:$0xff] %vm1033_vm11, %v1216_v54  ;;  %v1407_v9 = vadd.f32 %v1391_v36, %v1358_v15 }
 0x1a1   : > { %v1458_v58 = vadd.f32 %v2576_v60, %v1438_v7  ;;  %v1191_v62 = vpop.f32.mrf.mxu3 }
 0x1a2   : > { %1423 = vst.msk [vmem:[#allocation3 + $0x28] sm:$0xff] %vm1033_vm11, %v1407_v9  ;;  %v1225_v57 = vadd.f32 %v1209_v38, %v1191_v62 }
 0x1a3   : > { %v1474_v35 = vmax.f32 %v1458_v58, 0.0  ;;  %v1013_v19 = vpop.f32.mrf.mxu0  ;;  %v1363_v48 = vpop.f32.mrf.mxu2 }
 0x1a4   : > { %1241 = vst.msk [vmem:[#allocation3 + $0x78] sm:$0xff] %vm1033_vm11, %v1225_v57  ;;  %v1174_v18 = vpop.f32.mrf.mxu1  ;;  %v1400_v37 = vld [vmem:[#allocation3 + $0x70] sm:$0xff] }
 0x1a5   : > { %1490 = vst.msk [vmem:[%s2098_s30 + $0x20] sm:$0xff] %vm1033_vm11, %v1474_v35  ;;  %v1201_v63 = vld [vmem:[#allocation3 + $0x38] sm:$0xff] }
 0x1a6   : > { %v1217_v17 = vadd.f32 %v1201_v63, %v1171_v46  ;;  %1042 = vst.msk [vmem:[#allocation3 + $0x40] sm:$0xff] %vm1033_vm11, %v1013_v19 }
 0x1a7   : > { %v1392_v8 = vld [vmem:[#allocation3 + $0x30] sm:$0xff] }
 0x1a8   : > { %1233 = vst.msk [vmem:[#allocation3 + $0x38] sm:$0xff] %vm1033_vm11, %v1217_v17  ;;  %v1408_v31 = vadd.f32 %v1392_v8, %v1361_v33 }
 0x1a9   : > { %v1439_v39 = vld [vmem:[#allocation3 + $0x28] sm:$0xff]  ;;  %v1376_v55 = vpop.f32.mrf.mxu3 }
 0x1aa   : > { %v1459_v61 = vadd.f32 %v2576_v60, %v1439_v39  ;;  %1424 = vst.msk [vmem:[#allocation3 + $0x30] sm:$0xff] %vm1033_vm11, %v1408_v31  ;;  %v1414_v3 = vadd.f32 %v1398_v56, %v1376_v55 }
 0x1ab   : > { %v1015_v28 = vpop.f32.mrf.mxu0  ;;  %v1366_v51 = vpop.f32.mrf.mxu2  ;;  %v1401_v53 = vld [vmem:[#allocation3 + $0x78] sm:$0xff] }
 0x1ac   : > { %v1475_v23 = vmax.f32 %v1459_v61, 0.0  ;;  %1430 = vst.msk [vmem:[#allocation3 + $0x60] sm:$0xff] %vm1033_vm11, %v1414_v3  ;;  %v1176_v59 = vpop.f32.mrf.mxu1 }
 0x1ad   : > { %v1202_v50 = vld [vmem:[#allocation3 + $0x40] sm:$0xff]  ;;  %1043 = vst.msk [vmem:[#allocation3 + $0x48] sm:$0xff] %vm1033_vm11, %v1015_v28 }
 0x1ae   : > { %1491 = vst.msk [vmem:[%s2098_s30 + $0x28] sm:$0xff] %vm1033_vm11, %v1475_v23  ;;  %v1218_v2 = vadd.f32 %v1202_v50, %v1174_v18 }
 0x1af   : > { %v1393_v10 = vld [vmem:[#allocation3 + $0x38] sm:$0xff] }
 0x1b0   : > { %1234 = vst.msk [vmem:[#allocation3 + $0x40] sm:$0xff] %vm1033_vm11, %v1218_v2  ;;  %v1409_v13 = vadd.f32 %v1393_v10, %v1363_v48 }
 0x1b1   : > { %v1440_v29 = vld [vmem:[#allocation3 + $0x30] sm:$0xff]  ;;  %v1378_v5 = vpop.f32.mrf.mxu3 }
 0x1b2   : > { %v1460_v40 = vadd.f32 %v2576_v60, %v1440_v29  ;;  %1425 = vst.msk [vmem:[#allocation3 + $0x38] sm:$0xff] %vm1033_vm11, %v1409_v13  ;;  %v1415_v20 = vadd.f32 %v1399_v12, %v1378_v5 }
 0x1b3   : > { %v1446_v32 = vld [vmem:[#allocation3 + $0x60] sm:$0xff]  ;;  %v1018_v11 = vpop.f32.mrf.mxu0  ;;  %v1368_v4 = vpop.f32.mrf.mxu2 }
 0x1b4   : > { %v1476_v52 = vmax.f32 %v1460_v40, 0.0  ;;  %v1466_v24 = vadd.f32 %v2576_v60, %v1446_v32  ;;  %v1203_v34 = vld [vmem:[#allocation3 + $0x48] sm:$0xff]  ;;  %1431 = vst.msk [vmem:[#allocation3 + $0x68] sm:$0xff] %vm1033_vm11, %v1415_v20  ;;  %v1179_v44 = vpop.f32.mrf.mxu1 }
 0x1b5   : > { %v1219_v14 = vadd.f32 %v1203_v34, %v1176_v59  ;;  %1044 = vst.msk [vmem:[#allocation3 + $0x50] sm:$0xff] %vm1033_vm11, %v1018_v11 }
 0x1b6   : > { %1492 = vst.msk [vmem:[%s2098_s30 + $0x30] sm:$0xff] %vm1033_vm11, %v1476_v52  ;;  %v1482_v49 = vmax.f32 %v1466_v24, 0.0 }
 0x1b7   : > { %1235 = vst.msk [vmem:[#allocation3 + $0x48] sm:$0xff] %vm1033_vm11, %v1219_v14  ;;  %v1394_v25 = vld [vmem:[#allocation3 + $0x40] sm:$0xff] }
 0x1b8   : > { %1498 = vst.msk [vmem:[%s2098_s30 + $0x60] sm:$0xff] %vm1033_vm11, %v1482_v49  ;;  %v1410_v42 = vadd.f32 %v1394_v25, %v1366_v51 }
 0x1b9   : > { %v1441_v43 = vld [vmem:[#allocation3 + $0x38] sm:$0xff]  ;;  %v1381_v6 = vpop.f32.mrf.mxu3 }
 0x1ba   : > { %v1461_v45 = vadd.f32 %v2576_v60, %v1441_v43  ;;  %1426 = vst.msk [vmem:[#allocation3 + $0x40] sm:$0xff] %vm1033_vm11, %v1410_v42  ;;  %v1416_v15 = vadd.f32 %v1400_v37, %v1381_v6 }
 0x1bb   : > { %v1447_v22 = vld [vmem:[#allocation3 + $0x68] sm:$0xff]  ;;  %v1020_v0 = vpop.f32.mrf.mxu0  ;;  %v1371_v38 = vpop.f32.mrf.mxu2 }
 0x1bc   : > { %v1477_v27 = vmax.f32 %v1461_v45, 0.0  ;;  %v1467_v16 = vadd.f32 %v2576_v60, %v1447_v22  ;;  %v1204_v30 = vld [vmem:[#allocation3 + $0x50] sm:$0xff]  ;;  %1432 = vst.msk [vmem:[#allocation3 + $0x70] sm:$0xff] %vm1033_vm11, %v1416_v15  ;;  %v1181_v58 = vpop.f32.mrf.mxu1 }
 0x1bd   : > { %v1220_v41 = vadd.f32 %v1204_v30, %v1179_v44  ;;  %1045 = vst.msk [vmem:[#allocation3 + $0x58] sm:$0xff] %vm1033_vm11, %v1020_v0 }
 0x1be   : > { %1493 = vst.msk [vmem:[%s2098_s30 + $0x38] sm:$0xff] %vm1033_vm11, %v1477_v27  ;;  %v1483_v1 = vmax.f32 %v1467_v16, 0.0  ;;  %v1395_v21 = vld [vmem:[#allocation3 + $0x48] sm:$0xff] }
 0x1bf   : > { %1236 = vst.msk [vmem:[#allocation3 + $0x50] sm:$0xff] %vm1033_vm11, %v1220_v41  ;;  %v1411_v26 = vadd.f32 %v1395_v21, %v1368_v4 }
 0x1c0   : > { %1499 = vst.msk [vmem:[%s2098_s30 + $0x68] sm:$0xff] %vm1033_vm11, %v1483_v1 }
 0x1c1   : > { %v1442_v47 = vld [vmem:[#allocation3 + $0x40] sm:$0xff]  ;;  %1427 = vst.msk [vmem:[#allocation3 + $0x48] sm:$0xff] %vm1033_vm11, %v1411_v26  ;;  %v1383_v46 = vpop.f32.mrf.mxu3 }
 0x1c2   : > { %v1462_v33 = vadd.f32 %v2576_v60, %v1442_v47  ;;  %v1417_v54 = vadd.f32 %v1401_v53, %v1383_v46 }
 0x1c3   : > { %v1448_v36 = vld [vmem:[#allocation3 + $0x70] sm:$0xff]  ;;  %v1373_v55 = vpop.f32.mrf.mxu2 }
 0x1c4   : > { %v1478_v7 = vmax.f32 %v1462_v33, 0.0  ;;  %v1468_v9 = vadd.f32 %v2576_v60, %v1448_v36  ;;  %v1205_v62 = vld [vmem:[#allocation3 + $0x58] sm:$0xff]  ;;  %1433 = vst.msk [vmem:[#allocation3 + $0x78] sm:$0xff] %vm1033_vm11, %v1417_v54 }
 0x1c5   : > { %v1221_v57 = vadd.f32 %v1205_v62, %v1181_v58 }
 0x1c6   : > { %1494 = vst.msk [vmem:[%s2098_s30 + $0x40] sm:$0xff] %vm1033_vm11, %v1478_v7  ;;  %v1484_v35 = vmax.f32 %v1468_v9, 0.0  ;;  %v1396_v19 = vld [vmem:[#allocation3 + $0x50] sm:$0xff] }
 0x1c7   : > { %1237 = vst.msk [vmem:[#allocation3 + $0x58] sm:$0xff] %vm1033_vm11, %v1221_v57  ;;  %v1412_v63 = vadd.f32 %v1396_v19, %v1371_v38 }
 0x1c8   : > { %v1443_v17 = vld [vmem:[#allocation3 + $0x48] sm:$0xff]  ;;  %1500 = vst.msk [vmem:[%s2098_s30 + $0x70] sm:$0xff] %vm1033_vm11, %v1484_v35 }
 0x1c9   : > { %v1463_v18 = vadd.f32 %v2576_v60, %v1443_v17  ;;  %1428 = vst.msk [vmem:[#allocation3 + $0x50] sm:$0xff] %vm1033_vm11, %v1412_v63 }
 0x1cb   : > { %v1479_v48 = vmax.f32 %v1463_v18, 0.0  ;;  %v1449_v8 = vld [vmem:[#allocation3 + $0x78] sm:$0xff] }
 0x1cc   : > { %v1469_v31 = vadd.f32 %v2576_v60, %v1449_v8 }
 0x1cd   : > { %1495 = vst.msk [vmem:[%s2098_s30 + $0x48] sm:$0xff] %vm1033_vm11, %v1479_v48 }
 0x1ce   : > { %v1485_v39 = vmax.f32 %v1469_v31, 0.0  ;;  %v1397_v56 = vld [vmem:[#allocation3 + $0x58] sm:$0xff] }
 0x1cf   : > { %v1413_v61 = vadd.f32 %v1397_v56, %v1373_v55 }
 0x1d0   : > { %v1444_v3 = vld [vmem:[#allocation3 + $0x50] sm:$0xff]  ;;  %1501 = vst.msk [vmem:[%s2098_s30 + $0x78] sm:$0xff] %vm1033_vm11, %v1485_v39 }
 0x1d1   : > { %v1464_v28 = vadd.f32 %v2576_v60, %v1444_v3  ;;  %1429 = vst.msk [vmem:[#allocation3 + $0x58] sm:$0xff] %vm1033_vm11, %v1413_v61 }
 0x1d3   : > { %v1480_v23 = vmax.f32 %v1464_v28, 0.0 }
 0x1d5   : > { %1496 = vst.msk [vmem:[%s2098_s30 + $0x50] sm:$0xff] %vm1033_vm11, %v1480_v23 }
 0x1d8   : > { %v1445_v50 = vld [vmem:[#allocation3 + $0x58] sm:$0xff] }
 0x1d9   : > { %v1465_v2 = vadd.f32 %v2576_v60, %v1445_v50 }
 0x1db   : > { %v1481_v10 = vmax.f32 %v1465_v2, 0.0 }
 0x1dd   : > { %1497 = vst.msk [vmem:[%s2098_s30 + $0x58] sm:$0xff] %vm1033_vm11, %v1481_v10 }
 0x1de PF: > { %s13_s16 = sadd.s32 1, %s2031_s16   ;;  %s2688_s12 = smov %s2023_s14 }
 0x1df   : > { %p10_p8 = scmp.ge.s32.totalorder %s13_s16, 6   ;;  %s2689_s13 = smov %s2027_s15 }
 0x1e0   : > { %s2690_s14 = smov %s2693_s17  ;;  %s2691_s15 = smov %s2697_s18 }
 0x1e1   :  { %12 = sbr.rel (!%p10_p8) target bundleno = 3 (0x3), region = 79 }

</bundles_post_ra>
